<compile_context>
chip_gen: v5e
topology: v5e:2x2
jax: 0.10.0
libtpu: 0.0.40
codegen_flags: <defaults>
</compile_context>

<pallas_src>
import jax
import jax.numpy as jnp
from jax.experimental import pallas as pl
from jax.experimental.pallas import tpu as pltpu


# ---------------------------------------------------------------------------
# helpers
# ---------------------------------------------------------------------------
def _cdiv(a, b):
    return (a + b - 1) // b


def _round_up(x, m):
    return ((x + m - 1) // m) * m


_VMEM_LIMIT_CACHE = None


def _default_vmem_limit():
    """~3/4 of physical VMEM, capped at 96 MiB (v5e/v6e: 96 MiB, v7x: 48 MiB)."""
    global _VMEM_LIMIT_CACHE
    if _VMEM_LIMIT_CACHE is None:
        try:
            cap = int(pltpu.get_tpu_info().vmem_capacity_bytes)
        except Exception:
            cap = 64 * 1024 * 1024  # conservative (v7x per-TC size)
        _VMEM_LIMIT_CACHE = min((cap * 3) // 4, 96 * 1024 * 1024)
    return _VMEM_LIMIT_CACHE


# ---------------------------------------------------------------------------
# Pallas kernel: fused "concat of 3 inputs" -> Linear -> ReLU -> Linear
# The concat is realized as 3 accumulated matmuls against split W1 blocks.
# ---------------------------------------------------------------------------
def _make_mlp3_kernel(mean_divide, out_scale, compute_dtype):
    def _body(a, b, c, wa_ref, wb_ref, wc_ref, b1_ref, w2_ref, b2_ref, out_ref):
        # Three MXU pushes accumulate into one f32 hidden tile (== concat + dot).
        h = jnp.dot(a, wa_ref[...], preferred_element_type=jnp.float32)
        h = h + jnp.dot(b, wb_ref[...], preferred_element_type=jnp.float32)
        h = h + jnp.dot(c, wc_ref[...], preferred_element_type=jnp.float32)
        h = jnp.maximum(h + b1_ref[...], 0.0)                     # f32 bias+ReLU
        y = jnp.dot(h.astype(compute_dtype), w2_ref[...],
                    preferred_element_type=jnp.float32)
        y = y + b2_ref[...]
        if out_scale is not None:                                  # fused 1/agg_norm
            y = y * jnp.float32(out_scale)
        out_ref[...] = y.astype(out_ref.dtype)

    if mean_divide:
        def kernel(a_ref, b_ref, c_ref, cnt_a_ref, cnt_b_ref,
                   wa_ref, wb_ref, wc_ref, b1_ref, w2_ref, b2_ref, out_ref):
            # mean = segment_sum / max(count, 1), fused on the VPU.
            inv_a = 1.0 / jnp.maximum(cnt_a_ref[...], 1.0)
            inv_b = 1.0 / jnp.maximum(cnt_b_ref[...], 1.0)
            a = (a_ref[...].astype(jnp.float32) * inv_a).astype(compute_dtype)
            b = (b_ref[...].astype(jnp.float32) * inv_b).astype(compute_dtype)
            c = c_ref[...].astype(compute_dtype)
            _body(a, b, c, wa_ref, wb_ref, wc_ref, b1_ref, w2_ref, b2_ref, out_ref)
    else:
        def kernel(a_ref, b_ref, c_ref,
                   wa_ref, wb_ref, wc_ref, b1_ref, w2_ref, b2_ref, out_ref):
            _body(a_ref[...].astype(compute_dtype),
                  b_ref[...].astype(compute_dtype),
                  c_ref[...].astype(compute_dtype),
                  wa_ref, wb_ref, wc_ref, b1_ref, w2_ref, b2_ref, out_ref)
    return kernel


def _mlp3(a, b, c, wa, wb, wc, b1, w2, b2, *, counts=None, out_scale=None,
          out_dtype=jnp.float32, tile_rows=1024, compute_dtype=jnp.bfloat16,
          min_row_tiles=2):
    """y = relu([a|b|c] @ [wa;wb;wc] + b1) @ w2 + b2  (tiled over rows).

    No wrapper-side padding: all non-row block dims equal the full array dims,
    Mosaic pads inside vregs.  The row grid uses cdiv + OOB padding for the
    trailing partial block; partial output rows are masked on store.
    """
    rows = a.shape[0]
    hidden = w2.shape[0]
    out_dim = w2.shape[1]
    ka, kb, kc = a.shape[1], b.shape[1], c.shape[1]

    # Cap the tile so there are >= min_row_tiles grid steps (keeps both v7x
    # TensorCores fed); keep it a multiple of 8 for the (8,128) sublane rule.
    tile = min(tile_rows, max(8, _round_up(_cdiv(rows, min_row_tiles), 8)))
    grid = (_cdiv(rows, tile),)

    def row_spec(width):
        return pl.BlockSpec((tile, width), lambda i: (i, 0))

    def pin_spec(s0, s1):
        return pl.BlockSpec((s0, s1), lambda i: (0, 0))   # pinned weights/bias

    mean_divide = counts is not None
    kernel = _make_mlp3_kernel(mean_divide, out_scale, compute_dtype)

    operands = [a, b, c]
    in_specs = [row_spec(ka), row_spec(kb), row_spec(kc)]
    if mean_divide:
        cnt_a, cnt_b = counts
        operands += [cnt_a, cnt_b]
        in_specs += [row_spec(1), row_spec(1)]
    operands += [
        wa.astype(compute_dtype), wb.astype(compute_dtype), wc.astype(compute_dtype),
        b1.astype(jnp.float32).reshape(1, -1),
        w2.astype(compute_dtype),
        b2.astype(jnp.float32).reshape(1, -1),
    ]
    in_specs += [
        pin_spec(ka, hidden), pin_spec(kb, hidden), pin_spec(kc, hidden),
        pin_spec(1, hidden), pin_spec(hidden, out_dim), pin_spec(1, out_dim),
    ]

    return pl.pallas_call(
        kernel,
        out_shape=jax.ShapeDtypeStruct((rows, out_dim), out_dtype),
        grid_spec=pltpu.PrefetchScalarGridSpec(
            num_scalar_prefetch=0,
            grid=grid,
            in_specs=in_specs,
            out_specs=pl.BlockSpec((tile, out_dim), lambda i: (i, 0)),
        ),
        compiler_params=pltpu.CompilerParams(
            dimension_semantics=("parallel",),
            vmem_limit_bytes=_default_vmem_limit(),
        ),
    )(*operands)


# ---------------------------------------------------------------------------
# MessagePassingLayer forward (homogeneous graph)
# ---------------------------------------------------------------------------
def message_passing_layer(ndata, edata, senders, receivers, params, *,
                          aggregate_normalization=None, tile_rows=1024,
                          compute_dtype=jnp.bfloat16):
    """ndata: [N, node_in], edata: [E, edge_in], senders/receivers: [E] int32.

    Returns (new_ndata [N, node_out] f32, new_edata [E, edge_out] bf16).
    """
    n_nodes = ndata.shape[0]
    n_edges = edata.shape[0]

    # ---- edge phase -------------------------------------------------------
    # Gather once in the compute dtype (halves the largest intermediate);
    # edata is consumed by the kernel directly (cast in-kernel on the VPU).
    # TODO(synk): in-kernel gather of ndata rows (scalar-prefetched indices +
    #             manual DMA) would remove this wrapper gather entirely.
    ndata_c = ndata.astype(compute_dtype)
    src = jnp.take(ndata_c, senders, axis=0)
    dst = jnp.take(ndata_c, receivers, axis=0)
    e_new = _mlp3(src, dst, edata,
                  params["W1a"], params["W1b"], params["W1c"], params["b1"],
                  params["W2"], params["b2"],
                  out_dtype=compute_dtype,            # bf16 writeback (half traffic)
                  tile_rows=tile_rows, compute_dtype=compute_dtype)

    # ---- mean aggregation: segment sum / count ----------------------------
    # Isolated nodes get mean == 0 (sum of nothing / max(count,1)), matching
    # the DGL-style mean the PyTorch module relies on.
    # TODO(synk): replace the XLA scatter-add with an in-kernel segmented
    #             reduction over edges pre-sorted by node (scalar-prefetched
    #             per-node offsets), fused into the node-phase input build.
    e_f32 = e_new.astype(jnp.float32)                 # f32 accumulation downstream
    seg_s = jax.ops.segment_sum(e_f32, senders, num_segments=n_nodes)
    seg_d = jax.ops.segment_sum(e_f32, receivers, num_segments=n_nodes)
    ones = jnp.ones((n_edges, 1), jnp.float32)
    cnt_s = jax.ops.segment_sum(ones, senders, num_segments=n_nodes)
    cnt_d = jax.ops.segment_sum(ones, receivers, num_segments=n_nodes)

    # ---- node phase: mean division + normalization fused in-kernel --------
    out_scale = (None if aggregate_normalization is None
                 else 1.0 / float(aggregate_normalization))
    n_new = _mlp3(seg_s, seg_d, ndata,
                  params["V1a"], params["V1b"], params["V1c"], params["c1"],
                  params["V2"], params["c2"],
                  counts=(cnt_s, cnt_d), out_scale=out_scale,
                  out_dtype=jnp.float32,
                  tile_rows=tile_rows, compute_dtype=compute_dtype)
    return n_new, e_new


# ---------------------------------------------------------------------------
# Parameter init / prep (shapes follow MessagePassingLayer.__init__)
# ---------------------------------------------------------------------------
def init_params(key, node_in, edge_in, hidden, node_out, edge_out):
    ks = jax.random.split(key, 12)
    s = 0.1

    def mk(k, shape):
        return (s * jax.random.normal(k, shape)).astype(jnp.float32)

    # Edge MLP:  input = node_in (src) + node_in (dst) + edge_in
    # Node MLP:  input = edge_out (agg as src) + edge_out (agg as dst) + node_in
    return {
        "W1a": mk(ks[0], (node_in, hidden)),
        "W1b": mk(ks[1], (node_in, hidden)),
        "W1c": mk(ks[2], (edge_in, hidden)),
        "b1": mk(ks[3], (1, hidden)),
        "W2": mk(ks[4], (hidden, edge_out)),
        "b2": mk(ks[5], (1, edge_out)),
        "V1a": mk(ks[6], (edge_out, hidden)),
        "V1b": mk(ks[7], (edge_out, hidden)),
        "V1c": mk(ks[8], (node_in, hidden)),
        "c1": mk(ks[9], (1, hidden)),
        "V2": mk(ks[10], (hidden, node_out)),
        "c2": mk(ks[11], (1, node_out)),
    }


def prepare_params(params, compute_dtype=jnp.bfloat16):
    """One-time (outside jit) weight prep: cast weights to the MXU dtype,
    biases to f32 row vectors.  Avoids per-call cast/reshape HLO."""
    biases = ("b1", "b2", "c1", "c2")
    return {k: (jnp.asarray(v, jnp.float32).reshape(1, -1) if k in biases
                else jnp.asarray(v, compute_dtype))
            for k, v in params.items()}


# ---------------------------------------------------------------------------
# Pure-JAX f32 reference (sanity check of kernel semantics)
# ---------------------------------------------------------------------------
def reference_forward(ndata, edata, senders, receivers, p,
                      aggregate_normalization=None):
    x_e = jnp.concatenate(
        [jnp.take(ndata, senders, 0), jnp.take(ndata, receivers, 0), edata], -1)
    W1 = jnp.concatenate([p["W1a"], p["W1b"], p["W1c"]], 0)
    e_new = jnp.maximum(x_e @ W1 + p["b1"], 0.0) @ p["W2"] + p["b2"]

    n_nodes = ndata.shape[0]
    ones = jnp.ones((edata.shape[0],), jnp.float32)
    seg_s = jax.ops.segment_sum(e_new, senders, n_nodes)
    seg_d = jax.ops.segment_sum(e_new, receivers, n_nodes)
    cnt_s = jnp.maximum(jax.ops.segment_sum(ones, senders, n_nodes), 1.0)[:, None]
    cnt_d = jnp.maximum(jax.ops.segment_sum(ones, receivers, n_nodes), 1.0)[:, None]
    x_n = jnp.concatenate([seg_s / cnt_s, seg_d / cnt_d, ndata], -1)
    V1 = jnp.concatenate([p["V1a"], p["V1b"], p["V1c"]], 0)
    n_new = jnp.maximum(x_n @ V1 + p["c1"], 0.0) @ p["V2"] + p["c2"]
    if aggregate_normalization is not None:
        n_new = n_new / aggregate_normalization
    return n_new, e_new


if __name__ == "__main__":
    # Small synthetic graph, consistent with the module's homogeneous path.
    n_nodes, n_edges = 16, 64
    node_in, edge_in = 8, 4
    hidden, node_out, edge_out = 32, 8, 16
    agg_norm = 2.0

    key = jax.random.PRNGKey(0)
    k_n, k_e, k_s, k_r, k_p = jax.random.split(key, 5)

    ndata = jax.random.normal(k_n, (n_nodes, node_in), dtype=jnp.float32)
    edata = jax.random.normal(k_e, (n_edges, edge_in), dtype=jnp.float32)
    senders = jax.random.randint(k_s, (n_edges,), 0, n_nodes, dtype=jnp.int32)
    receivers = jax.random.randint(k_r, (n_edges,), 0, n_nodes, dtype=jnp.int32)

    params = init_params(k_p, node_in, edge_in, hidden, node_out, edge_out)
    prepped = prepare_params(params)               # hoisted out of the jitted step

    fwd = jax.jit(lambda nd, ed, s, r: message_passing_layer(
        nd, ed, s, r, prepped, aggregate_normalization=agg_norm))
    new_ndata, new_edata = fwd(ndata, edata, senders, receivers)
    jax.block_until_ready((new_ndata, new_edata))

    ref_ndata, ref_edata = reference_forward(
        ndata, edata, senders, receivers, params,
        aggregate_normalization=agg_norm)
    # bf16 MXU math / bf16 edge writeback vs f32 reference -> loose tolerance.
    assert jnp.allclose(new_edata.astype(jnp.float32), ref_edata,
                        atol=5e-2, rtol=5e-2)
    assert jnp.allclose(new_ndata, ref_ndata, atol=5e-2, rtol=5e-2)

    print("KERNEL_OK")
</pallas_src>

<mosaic_0001>
module attributes {stable_mosaic.version = 11 : i64} {
  func.func @kernel(%arg0: i32, %arg1: memref<32x8xbf16, #tpu.memory_space<vmem>>, %arg2: memref<32x8xbf16, #tpu.memory_space<vmem>>, %arg3: memref<32x4xf32, #tpu.memory_space<vmem>>, %arg4: memref<8x32xbf16, #tpu.memory_space<vmem>>, %arg5: memref<8x32xbf16, #tpu.memory_space<vmem>>, %arg6: memref<4x32xbf16, #tpu.memory_space<vmem>>, %arg7: memref<1x32xf32, #tpu.memory_space<vmem>>, %arg8: memref<32x16xbf16, #tpu.memory_space<vmem>>, %arg9: memref<1x16xf32, #tpu.memory_space<vmem>>, %arg10: memref<32x16xbf16, #tpu.memory_space<vmem>>) attributes {dimension_semantics = [#tpu.dimension_semantics<parallel>], iteration_bounds = array<i64: 2>, scalar_prefetch = 0 : i64, scratch_operands = 0 : i64, tpu.core_type = #tpu.core_type<tc>, window_params = [{transform_indices = @transform_0, window_bounds = array<i64: 32, 8>}, {transform_indices = @transform_1, window_bounds = array<i64: 32, 8>}, {transform_indices = @transform_2, window_bounds = array<i64: 32, 4>}, {pipeline_mode = #tpu.pipeline_mode<synchronous>, transform_indices = @transform_3, window_bounds = array<i64: 8, 32>}, {pipeline_mode = #tpu.pipeline_mode<synchronous>, transform_indices = @transform_4, window_bounds = array<i64: 8, 32>}, {pipeline_mode = #tpu.pipeline_mode<synchronous>, transform_indices = @transform_5, window_bounds = array<i64: 4, 32>}, {pipeline_mode = #tpu.pipeline_mode<synchronous>, transform_indices = @transform_6, window_bounds = array<i64: 1, 32>}, {pipeline_mode = #tpu.pipeline_mode<synchronous>, transform_indices = @transform_7, window_bounds = array<i64: 32, 16>}, {pipeline_mode = #tpu.pipeline_mode<synchronous>, transform_indices = @transform_8, window_bounds = array<i64: 1, 16>}, {transform_indices = @transform_9, window_bounds = array<i64: 32, 16>}]} {
    %c0 = arith.constant 0 : index
    %c0_0 = arith.constant 0 : index
    %0 = vector.load %arg1[%c0, %c0_0] : memref<32x8xbf16, #tpu.memory_space<vmem>>, vector<32x8xbf16>
    %c0_1 = arith.constant 0 : index
    %c0_2 = arith.constant 0 : index
    %1 = vector.load %arg2[%c0_1, %c0_2] : memref<32x8xbf16, #tpu.memory_space<vmem>>, vector<32x8xbf16>
    %c0_3 = arith.constant 0 : index
    %c0_4 = arith.constant 0 : index
    %2 = vector.load %arg3[%c0_3, %c0_4] : memref<32x4xf32, #tpu.memory_space<vmem>>, vector<32x4xf32>
    %3 = arith.truncf %2 : vector<32x4xf32> to vector<32x4xbf16>
    %c0_5 = arith.constant 0 : index
    %c0_6 = arith.constant 0 : index
    %4 = vector.load %arg4[%c0_5, %c0_6] : memref<8x32xbf16, #tpu.memory_space<vmem>>, vector<8x32xbf16>
    %cst = arith.constant dense<0.000000e+00> : vector<32x32xf32>
    %5 = tpu.matmul %0, %4, %cst {dimension_numbers = #tpu.dot_dimension_numbers<[1], [0], [0], [1], [0, 0, 1, 1], [], []>} : vector<32x8xbf16>, vector<8x32xbf16>, vector<32x32xf32> -> vector<32x32xf32>
    %c0_7 = arith.constant 0 : index
    %c0_8 = arith.constant 0 : index
    %6 = vector.load %arg5[%c0_7, %c0_8] : memref<8x32xbf16, #tpu.memory_space<vmem>>, vector<8x32xbf16>
    %cst_9 = arith.constant dense<0.000000e+00> : vector<32x32xf32>
    %7 = tpu.matmul %1, %6, %cst_9 {dimension_numbers = #tpu.dot_dimension_numbers<[1], [0], [0], [1], [0, 0, 1, 1], [], []>} : vector<32x8xbf16>, vector<8x32xbf16>, vector<32x32xf32> -> vector<32x32xf32>
    %8 = arith.addf %5, %7 : vector<32x32xf32>
    %c0_10 = arith.constant 0 : index
    %c0_11 = arith.constant 0 : index
    %9 = vector.load %arg6[%c0_10, %c0_11] : memref<4x32xbf16, #tpu.memory_space<vmem>>, vector<4x32xbf16>
    %cst_12 = arith.constant dense<0.000000e+00> : vector<32x32xf32>
    %10 = tpu.matmul %3, %9, %cst_12 {dimension_numbers = #tpu.dot_dimension_numbers<[1], [0], [0], [1], [0, 0, 1, 1], [], []>} : vector<32x4xbf16>, vector<4x32xbf16>, vector<32x32xf32> -> vector<32x32xf32>
    %11 = arith.addf %8, %10 : vector<32x32xf32>
    %c0_13 = arith.constant 0 : index
    %c0_14 = arith.constant 0 : index
    %12 = vector.load %arg7[%c0_13, %c0_14] : memref<1x32xf32, #tpu.memory_space<vmem>>, vector<1x32xf32>
    %13 = vector.broadcast %12 : vector<1x32xf32> to vector<32x32xf32>
    %14 = arith.addf %11, %13 : vector<32x32xf32>
    %cst_15 = arith.constant 0.000000e+00 : f32
    %15 = vector.broadcast %cst_15 : f32 to vector<32x32xf32>
    %16 = arith.maximumf %14, %15 : vector<32x32xf32>
    %17 = arith.truncf %16 : vector<32x32xf32> to vector<32x32xbf16>
    %c0_16 = arith.constant 0 : index
    %c0_17 = arith.constant 0 : index
    %18 = vector.load %arg8[%c0_16, %c0_17] : memref<32x16xbf16, #tpu.memory_space<vmem>>, vector<32x16xbf16>
    %cst_18 = arith.constant dense<0.000000e+00> : vector<32x16xf32>
    %19 = tpu.matmul %17, %18, %cst_18 {dimension_numbers = #tpu.dot_dimension_numbers<[1], [0], [0], [1], [0, 0, 1, 1], [], []>} : vector<32x32xbf16>, vector<32x16xbf16>, vector<32x16xf32> -> vector<32x16xf32>
    %c0_19 = arith.constant 0 : index
    %c0_20 = arith.constant 0 : index
    %20 = vector.load %arg9[%c0_19, %c0_20] : memref<1x16xf32, #tpu.memory_space<vmem>>, vector<1x16xf32>
    %21 = vector.broadcast %20 : vector<1x16xf32> to vector<32x16xf32>
    %22 = arith.addf %19, %21 : vector<32x16xf32>
    %23 = arith.truncf %22 : vector<32x16xf32> to vector<32x16xbf16>
    %c0_21 = arith.constant 0 : index
    %c0_22 = arith.constant 0 : index
    %24 = vector.load %arg10[%c0_21, %c0_22] : memref<32x16xbf16, #tpu.memory_space<vmem>>, vector<32x16xbf16>
    tpu.vector_store %arg10[%c0_21, %c0_22], %23 {strides = array<i32>} : memref<32x16xbf16, #tpu.memory_space<vmem>>, vector<32x16xbf16>,
    return
  }
  func.func @transform_0(%arg0: i32) -> (i32, i32) {
    %c0_i32 = arith.constant 0 : i32
    %c0_i32_0 = arith.constant 0 : i32
    return %arg0, %c0_i32 : i32, i32
  }
  func.func @transform_1(%arg0: i32) -> (i32, i32) {
    %c0_i32 = arith.constant 0 : i32
    %c0_i32_0 = arith.constant 0 : i32
    return %arg0, %c0_i32 : i32, i32
  }
  func.func @transform_2(%arg0: i32) -> (i32, i32) {
    %c0_i32 = arith.constant 0 : i32
    %c0_i32_0 = arith.constant 0 : i32
    return %arg0, %c0_i32 : i32, i32
  }
  func.func @transform_3(%arg0: i32) -> (i32, i32) {
    %c0_i32 = arith.constant 0 : i32
    %c0_i32_0 = arith.constant 0 : i32
    %c0_i32_1 = arith.constant 0 : i32
    return %c0_i32, %c0_i32_0 : i32, i32
  }
  func.func @transform_4(%arg0: i32) -> (i32, i32) {
    %c0_i32 = arith.constant 0 : i32
    %c0_i32_0 = arith.constant 0 : i32
    %c0_i32_1 = arith.constant 0 : i32
    return %c0_i32, %c0_i32_0 : i32, i32
  }
  func.func @transform_5(%arg0: i32) -> (i32, i32) {
    %c0_i32 = arith.constant 0 : i32
    %c0_i32_0 = arith.constant 0 : i32
    %c0_i32_1 = arith.constant 0 : i32
    return %c0_i32, %c0_i32_0 : i32, i32
  }
  func.func @transform_6(%arg0: i32) -> (i32, i32) {
    %c0_i32 = arith.constant 0 : i32
    %c0_i32_0 = arith.constant 0 : i32
    %c0_i32_1 = arith.constant 0 : i32
    return %c0_i32, %c0_i32_0 : i32, i32
  }
  func.func @transform_7(%arg0: i32) -> (i32, i32) {
    %c0_i32 = arith.constant 0 : i32
    %c0_i32_0 = arith.constant 0 : i32
    %c0_i32_1 = arith.constant 0 : i32
    return %c0_i32, %c0_i32_0 : i32, i32
  }
  func.func @transform_8(%arg0: i32) -> (i32, i32) {
    %c0_i32 = arith.constant 0 : i32
    %c0_i32_0 = arith.constant 0 : i32
    %c0_i32_1 = arith.constant 0 : i32
    return %c0_i32, %c0_i32_0 : i32, i32
  }
  func.func @transform_9(%arg0: i32) -> (i32, i32) {
    %c0_i32 = arith.constant 0 : i32
    %c0_i32_0 = arith.constant 0 : i32
    return %arg0, %c0_i32 : i32, i32
  }
}

module attributes {stable_mosaic.version = 11 : i64} {
  func.func @kernel(%arg0: i32, %arg1: memref<8x16xf32, #tpu.memory_space<vmem>>, %arg2: memref<8x16xf32, #tpu.memory_space<vmem>>, %arg3: memref<8x8xf32, #tpu.memory_space<vmem>>, %arg4: memref<8x1xf32, #tpu.memory_space<vmem>>, %arg5: memref<8x1xf32, #tpu.memory_space<vmem>>, %arg6: memref<16x32xbf16, #tpu.memory_space<vmem>>, %arg7: memref<16x32xbf16, #tpu.memory_space<vmem>>, %arg8: memref<8x32xbf16, #tpu.memory_space<vmem>>, %arg9: memref<1x32xf32, #tpu.memory_space<vmem>>, %arg10: memref<32x8xbf16, #tpu.memory_space<vmem>>, %arg11: memref<1x8xf32, #tpu.memory_space<vmem>>, %arg12: memref<8x8xf32, #tpu.memory_space<vmem>>) attributes {dimension_semantics = [#tpu.dimension_semantics<parallel>], iteration_bounds = array<i64: 2>, scalar_prefetch = 0 : i64, scratch_operands = 0 : i64, tpu.core_type = #tpu.core_type<tc>, window_params = [{transform_indices = @transform_0, window_bounds = array<i64: 8, 16>}, {transform_indices = @transform_1, window_bounds = array<i64: 8, 16>}, {transform_indices = @transform_2, window_bounds = array<i64: 8, 8>}, {transform_indices = @transform_3, window_bounds = array<i64: 8, 1>}, {transform_indices = @transform_4, window_bounds = array<i64: 8, 1>}, {pipeline_mode = #tpu.pipeline_mode<synchronous>, transform_indices = @transform_5, window_bounds = array<i64: 16, 32>}, {pipeline_mode = #tpu.pipeline_mode<synchronous>, transform_indices = @transform_6, window_bounds = array<i64: 16, 32>}, {pipeline_mode = #tpu.pipeline_mode<synchronous>, transform_indices = @transform_7, window_bounds = array<i64: 8, 32>}, {pipeline_mode = #tpu.pipeline_mode<synchronous>, transform_indices = @transform_8, window_bounds = array<i64: 1, 32>}, {pipeline_mode = #tpu.pipeline_mode<synchronous>, transform_indices = @transform_9, window_bounds = array<i64: 32, 8>}, {pipeline_mode = #tpu.pipeline_mode<synchronous>, transform_indices = @transform_10, window_bounds = array<i64: 1, 8>}, {transform_indices = @transform_11, window_bounds = array<i64: 8, 8>}]} {
    %c0 = arith.constant 0 : index
    %c0_0 = arith.constant 0 : index
    %0 = vector.load %arg4[%c0, %c0_0] : memref<8x1xf32, #tpu.memory_space<vmem>>, vector<8x1xf32>
    %cst = arith.constant 1.000000e+00 : f32
    %1 = vector.broadcast %cst : f32 to vector<8x1xf32>
    %2 = arith.maximumf %0, %1 : vector<8x1xf32>
    %cst_1 = arith.constant 1.000000e+00 : f32
    %3 = vector.broadcast %cst_1 : f32 to vector<8x1xf32>
    %4 = arith.divf %3, %2 : vector<8x1xf32>
    %c0_2 = arith.constant 0 : index
    %c0_3 = arith.constant 0 : index
    %5 = vector.load %arg5[%c0_2, %c0_3] : memref<8x1xf32, #tpu.memory_space<vmem>>, vector<8x1xf32>
    %cst_4 = arith.constant 1.000000e+00 : f32
    %6 = vector.broadcast %cst_4 : f32 to vector<8x1xf32>
    %7 = arith.maximumf %5, %6 : vector<8x1xf32>
    %cst_5 = arith.constant 1.000000e+00 : f32
    %8 = vector.broadcast %cst_5 : f32 to vector<8x1xf32>
    %9 = arith.divf %8, %7 : vector<8x1xf32>
    %c0_6 = arith.constant 0 : index
    %c0_7 = arith.constant 0 : index
    %10 = vector.load %arg1[%c0_6, %c0_7] : memref<8x16xf32, #tpu.memory_space<vmem>>, vector<8x16xf32>
    %11 = vector.broadcast %4 : vector<8x1xf32> to vector<8x16xf32>
    %12 = arith.mulf %10, %11 : vector<8x16xf32>
    %13 = arith.truncf %12 : vector<8x16xf32> to vector<8x16xbf16>
    %c0_8 = arith.constant 0 : index
    %c0_9 = arith.constant 0 : index
    %14 = vector.load %arg2[%c0_8, %c0_9] : memref<8x16xf32, #tpu.memory_space<vmem>>, vector<8x16xf32>
    %15 = vector.broadcast %9 : vector<8x1xf32> to vector<8x16xf32>
    %16 = arith.mulf %14, %15 : vector<8x16xf32>
    %17 = arith.truncf %16 : vector<8x16xf32> to vector<8x16xbf16>
    %c0_10 = arith.constant 0 : index
    %c0_11 = arith.constant 0 : index
    %18 = vector.load %arg3[%c0_10, %c0_11] : memref<8x8xf32, #tpu.memory_space<vmem>>, vector<8x8xf32>
    %19 = arith.truncf %18 : vector<8x8xf32> to vector<8x8xbf16>
    %c0_12 = arith.constant 0 : index
    %c0_13 = arith.constant 0 : index
    %20 = vector.load %arg6[%c0_12, %c0_13] : memref<16x32xbf16, #tpu.memory_space<vmem>>, vector<16x32xbf16>
    %cst_14 = arith.constant dense<0.000000e+00> : vector<8x32xf32>
    %21 = tpu.matmul %13, %20, %cst_14 {dimension_numbers = #tpu.dot_dimension_numbers<[1], [0], [0], [1], [0, 0, 1, 1], [], []>} : vector<8x16xbf16>, vector<16x32xbf16>, vector<8x32xf32> -> vector<8x32xf32>
    %c0_15 = arith.constant 0 : index
    %c0_16 = arith.constant 0 : index
    %22 = vector.load %arg7[%c0_15, %c0_16] : memref<16x32xbf16, #tpu.memory_space<vmem>>, vector<16x32xbf16>
    %cst_17 = arith.constant dense<0.000000e+00> : vector<8x32xf32>
    %23 = tpu.matmul %17, %22, %cst_17 {dimension_numbers = #tpu.dot_dimension_numbers<[1], [0], [0], [1], [0, 0, 1, 1], [], []>} : vector<8x16xbf16>, vector<16x32xbf16>, vector<8x32xf32> -> vector<8x32xf32>
    %24 = arith.addf %21, %23 : vector<8x32xf32>
    %c0_18 = arith.constant 0 : index
    %c0_19 = arith.constant 0 : index
    %25 = vector.load %arg8[%c0_18, %c0_19] : memref<8x32xbf16, #tpu.memory_space<vmem>>, vector<8x32xbf16>
    %cst_20 = arith.constant dense<0.000000e+00> : vector<8x32xf32>
    %26 = tpu.matmul %19, %25, %cst_20 {dimension_numbers = #tpu.dot_dimension_numbers<[1], [0], [0], [1], [0, 0, 1, 1], [], []>} : vector<8x8xbf16>, vector<8x32xbf16>, vector<8x32xf32> -> vector<8x32xf32>
    %27 = arith.addf %24, %26 : vector<8x32xf32>
    %c0_21 = arith.constant 0 : index
    %c0_22 = arith.constant 0 : index
    %28 = vector.load %arg9[%c0_21, %c0_22] : memref<1x32xf32, #tpu.memory_space<vmem>>, vector<1x32xf32>
    %29 = vector.broadcast %28 : vector<1x32xf32> to vector<8x32xf32>
    %30 = arith.addf %27, %29 : vector<8x32xf32>
    %cst_23 = arith.constant 0.000000e+00 : f32
    %31 = vector.broadcast %cst_23 : f32 to vector<8x32xf32>
    %32 = arith.maximumf %30, %31 : vector<8x32xf32>
    %33 = arith.truncf %32 : vector<8x32xf32> to vector<8x32xbf16>
    %c0_24 = arith.constant 0 : index
    %c0_25 = arith.constant 0 : index
    %34 = vector.load %arg10[%c0_24, %c0_25] : memref<32x8xbf16, #tpu.memory_space<vmem>>, vector<32x8xbf16>
    %cst_26 = arith.constant dense<0.000000e+00> : vector<8x8xf32>
    %35 = tpu.matmul %33, %34, %cst_26 {dimension_numbers = #tpu.dot_dimension_numbers<[1], [0], [0], [1], [0, 0, 1, 1], [], []>} : vector<8x32xbf16>, vector<32x8xbf16>, vector<8x8xf32> -> vector<8x8xf32>
    %c0_27 = arith.constant 0 : index
    %c0_28 = arith.constant 0 : index
    %36 = vector.load %arg11[%c0_27, %c0_28] : memref<1x8xf32, #tpu.memory_space<vmem>>, vector<1x8xf32>
    %37 = vector.broadcast %36 : vector<1x8xf32> to vector<8x8xf32>
    %38 = arith.addf %35, %37 : vector<8x8xf32>
    %cst_29 = arith.constant 5.000000e-01 : f32
    %39 = vector.broadcast %cst_29 : f32 to vector<8x8xf32>
    %40 = arith.mulf %38, %39 : vector<8x8xf32>
    %c0_30 = arith.constant 0 : index
    %c0_31 = arith.constant 0 : index
    %41 = vector.load %arg12[%c0_30, %c0_31] : memref<8x8xf32, #tpu.memory_space<vmem>>, vector<8x8xf32>
    tpu.vector_store %arg12[%c0_30, %c0_31], %40 {strides = array<i32>} : memref<8x8xf32, #tpu.memory_space<vmem>>, vector<8x8xf32>,
    return
  }
  func.func @transform_0(%arg0: i32) -> (i32, i32) {
    %c0_i32 = arith.constant 0 : i32
    %c0_i32_0 = arith.constant 0 : i32
    return %arg0, %c0_i32 : i32, i32
  }
  func.func @transform_1(%arg0: i32) -> (i32, i32) {
    %c0_i32 = arith.constant 0 : i32
    %c0_i32_0 = arith.constant 0 : i32
    return %arg0, %c0_i32 : i32, i32
  }
  func.func @transform_2(%arg0: i32) -> (i32, i32) {
    %c0_i32 = arith.constant 0 : i32
    %c0_i32_0 = arith.constant 0 : i32
    return %arg0, %c0_i32 : i32, i32
  }
  func.func @transform_3(%arg0: i32) -> (i32, i32) {
    %c0_i32 = arith.constant 0 : i32
    %c0_i32_0 = arith.constant 0 : i32
    return %arg0, %c0_i32 : i32, i32
  }
  func.func @transform_4(%arg0: i32) -> (i32, i32) {
    %c0_i32 = arith.constant 0 : i32
    %c0_i32_0 = arith.constant 0 : i32
    return %arg0, %c0_i32 : i32, i32
  }
  func.func @transform_5(%arg0: i32) -> (i32, i32) {
    %c0_i32 = arith.constant 0 : i32
    %c0_i32_0 = arith.constant 0 : i32
    %c0_i32_1 = arith.constant 0 : i32
    return %c0_i32, %c0_i32_0 : i32, i32
  }
  func.func @transform_6(%arg0: i32) -> (i32, i32) {
    %c0_i32 = arith.constant 0 : i32
    %c0_i32_0 = arith.constant 0 : i32
    %c0_i32_1 = arith.constant 0 : i32
    return %c0_i32, %c0_i32_0 : i32, i32
  }
  func.func @transform_7(%arg0: i32) -> (i32, i32) {
    %c0_i32 = arith.constant 0 : i32
    %c0_i32_0 = arith.constant 0 : i32
    %c0_i32_1 = arith.constant 0 : i32
    return %c0_i32, %c0_i32_0 : i32, i32
  }
  func.func @transform_8(%arg0: i32) -> (i32, i32) {
    %c0_i32 = arith.constant 0 : i32
    %c0_i32_0 = arith.constant 0 : i32
    %c0_i32_1 = arith.constant 0 : i32
    return %c0_i32, %c0_i32_0 : i32, i32
  }
  func.func @transform_9(%arg0: i32) -> (i32, i32) {
    %c0_i32 = arith.constant 0 : i32
    %c0_i32_0 = arith.constant 0 : i32
    %c0_i32_1 = arith.constant 0 : i32
    return %c0_i32, %c0_i32_0 : i32, i32
  }
  func.func @transform_10(%arg0: i32) -> (i32, i32) {
    %c0_i32 = arith.constant 0 : i32
    %c0_i32_0 = arith.constant 0 : i32
    %c0_i32_1 = arith.constant 0 : i32
    return %c0_i32, %c0_i32_0 : i32, i32
  }
  func.func @transform_11(%arg0: i32) -> (i32, i32) {
    %c0_i32 = arith.constant 0 : i32
    %c0_i32_0 = arith.constant 0 : i32
    return %arg0, %c0_i32 : i32, i32
  }
}

</mosaic_0001>

<bundles_post_ra>
// kernel: _lambda_.2
= control target key start
LH: loop header
LB: loop body
LE: loop exit
PB: predicated region body
PF: predicated region fallthrough
CT: control target
= control target key end

     0   :  { %s780_s30 = smov 0   ;;  %s835_s0 = inlined_call_operand.vmem [shape: bf16[64,8], index: 0, kind: input, shape index: {}]   ;;  %s836_s1 = inlined_call_operand.vmem [shape: bf16[64,8], index: 1, kind: input, shape index: {}]   ;;  %s837_s2 = inlined_call_operand.vmem [shape: f32[64,4], index: 2, kind: input, shape index: {}]   ;;  %s838_s3 = inlined_call_operand.vmem [shape: bf16[8,32], index: 3, kind: input, shape index: {}]   ;;  %s839_s4 = inlined_call_operand.vmem [shape: bf16[8,32], index: 4, kind: input, shape index: {}]   ;;  %s840_s5 = inlined_call_operand.vmem [shape: bf16[4,32], index: 5, kind: input, shape index: {}]   ;;  %s841_s6 = inlined_call_operand.vmem [shape: f32[1,32], index: 6, kind: input, shape index: {}]   ;;  %s842_s7 = inlined_call_operand.vmem [shape: bf16[32,16], index: 7, kind: input, shape index: {}]   ;;  %s843_s8 = inlined_call_operand.vmem [shape: f32[1,16], index: 8, kind: input, shape index: {}]   ;;  %s844_s9 = inlined_call_operand.vmem [shape: bf16[64,16], index: 9, kind: output, shape index: {}]  }
   0x1 LB: > { %s659_s10 = sadd.s32 4294967295, %s728_s30   ;;  %p663_p0 = scmp.ge.s32.totalorder %s728_s30, 1  ;;  %s728_s30 = sphi %s780_s30, %s19_s30  }
   0x2   : > { %p310_p1 = scmp.lt.s32.totalorder %s728_s30, 3 }
   0x4   : > { %p311_p2 = pnand %p663_p0, %p310_p1 }
   0x5   : > { %s664_s17 = sshll.u32 (!%p311_p2), %s659_s10, 2 }
   0x6   : > { %314 = sbr.rel (%p311_p2) target bundleno = 328 (0x148), region = 56  ;;  %p357_p3 = scmp.lt.s32.totalorder (!%p311_p2), %s664_s17, 7 }
   0xb   : > { %v396_v0 = vld [vmem:[%s839_s4] sm:$0xf]  ;;  %vm414_vm0 = vcmask 1043456   ;;  %vm483_vm1 = vcmask 1041408   ;;  %s846_s17 = smov (!%p357_p3, %s664_s17), 7  ;;  %vm407_vm2 = vcmask 64512  }
   0xc   : > { %v395_v1 = vld [vmem:[%s838_s3] sm:$0xf]  ;;  %v416_v2 = vsel %vm414_vm0, %v396_v0, 0  ;;  %s797_s18 = sshll.u32 %s846_s17, 2  ;;  %s669_s19 = sshll.u32 %s846_s17, 3  ;;  %vm476_vm3 = vcmask 31744  }
   0xd   : > { %v454_v3 = vsel %vm414_vm0, %v395_v1, 0  ;;  %v475_v4 = vld [vmem:[%s840_s5] sm:$0x3]  ;;  %425 = vmatpush.bf16.msra.mxu0 %v416_v2  ;;  %s366_s22 = scalar_lea.vmem %s836_s1, %s797_s18  ;;  %s360_s25 = scalar_lea.vmem %s835_s0, %s797_s18  ;;  %v711_v16 = vld [vmem:[%s842_s7 + $0x8] sm:$0xff]  ;;  %vm544_vm4 = vcmask 261120   ;;  %vm574_vm5 = vcmask 125952  }
   0xe   : > { %463 = vmatpush.bf16.msra.mxu1 %v454_v3  ;;  %v485_v5 = vsel %vm483_vm1, %v475_v4, 0  ;;  %v708_v6 = vld [vmem:[%s366_s22] sm:$0xff]  ;;  %s372_s28 = scalar_lea.vmem %s837_s2, %s669_s19  ;;  %v709_v13 = vld [vmem:[%s366_s22 + $0x8] sm:$0xff]  ;;  %557 = vmatpush.bf16.msra.mxu3 %v711_v16  ;;  %s378_s20 = scalar_lea.vmem %s844_s9, %s797_s18 }
   0xf   : > { %494 = vmatpush.bf16.msra.mxu2 %v485_v5  ;;  %v706_v7 = vld [vmem:[%s360_s25] sm:$0xff]  ;;  %v390_v9 = vld [vmem:[%s372_s28 + $0x8] sm:$0xff]  ;;  %v391_v11 = vld [vmem:[%s372_s28 + $0x10] sm:$0xff] }
  0x10   : > { %v389_v8 = vld [vmem:[%s372_s28] sm:$0xff]  ;;  %680 = vmatmul.msk.bf16.vlgmr.msra.gmra.mxu0 %vm407_vm2, %v708_v6  ;;  %v392_v12 = vld [vmem:[%s372_s28 + $0x18] sm:$0xff]  ;;  %v707_v14 = vld [vmem:[%s360_s25 + $0x8] sm:$0xff] }
  0x11   : > { %690 = vmatmul.msk.bf16.vlgmr.msra.gmra.mxu1 %vm407_vm2, %v706_v7  ;;  %v393_v10 = vpack.c.bf16 %v390_v9, %v389_v8  ;;  %v394_v15 = vpack.c.bf16 %v392_v12, %v391_v11  ;;  %v710_v17 = vld [vmem:[%s842_s7] sm:$0xff] }
  0x12   : > { %558 = vmatpush.bf16.msra.mxu3 %v710_v17  ;;  %v720_v25 = vld [vmem:[%s841_s6] ss:$0 sm:$0xff] }
  0x13   : > { %692 = vmatmul.msk.bf16.vlgmr.msra.gmra.mxu2 %vm476_vm3, %v393_v10  ;;  %v721_v49 = vld [vmem:[%s843_s8] ss:$0 sm:$0xff] }
  0x20   : > { %681 = vmatmul.msk.bf16.gmra.mxu0 %vm407_vm2, %v709_v13 }
  0x21   : > { %691 = vmatmul.msk.bf16.gmra.mxu1 %vm407_vm2, %v707_v14 }
  0x23   : > { %693 = vmatmul.msk.bf16.gmra.mxu2 %vm476_vm3, %v394_v15 }
  0x8d   : > { %v427_v18 = vpop.f32.mrf.mxu0 }
  0x8e   : > { %v465_v19 = vpop.f32.mrf.mxu1 }
  0x8f   : > { %v466_v22 = vadd.f32 %v465_v19, %v427_v18 }
  0x95   : > { %v429_v21 = vpop.f32.mrf.mxu0 }
  0x96   : > { %v496_v20 = vpop.f32.mrf.mxu2  ;;  %v467_v23 = vpop.f32.mrf.mxu1 }
  0x97   : > { %v506_v24 = vadd.f32 %v496_v20, %v466_v22  ;;  %v468_v26 = vadd.f32 %v467_v23, %v429_v21 }
  0x99   : > { %v514_v28 = vadd.f32 %v720_v25, %v506_v24 }
  0x9b   : > { %v518_v33 = vmax.f32 %v514_v28, 0.0 }
  0x9d   : > { %v432_v30 = vpop.f32.mrf.mxu0 }
  0x9e   : > { %v498_v27 = vpop.f32.mrf.mxu2  ;;  %v470_v31 = vpop.f32.mrf.mxu1 }
  0x9f   : > { %v507_v29 = vadd.f32 %v498_v27, %v468_v26  ;;  %v471_v37 = vadd.f32 %v470_v31, %v432_v30 }
  0xa1   : > { %v515_v32 = vadd.f32 %v720_v25, %v507_v29 }
  0xa3   : > { %v519_v34 = vmax.f32 %v515_v32, 0.0 }
  0xa5   : > { %v522_v35 = vpack.c.bf16 %v519_v34, %v518_v33  ;;  %v434_v38 = vpop.f32.mrf.mxu0 }
  0xa6   : > { %v501_v36 = vpop.f32.mrf.mxu2  ;;  %v472_v39 = vpop.f32.mrf.mxu1 }
  0xa7   : > { %702 = vmatmul.msk.bf16.vlgmr.msra.gmra.mxu3 %vm544_vm4, %v522_v35  ;;  %v508_v40 = vadd.f32 %v501_v36, %v471_v37  ;;  %v473_v41 = vadd.f32 %v472_v39, %v434_v38 }
  0xa9   : > { %v516_v43 = vadd.f32 %v720_v25, %v508_v40 }
  0xab   : > { %v520_v46 = vmax.f32 %v516_v43, 0.0 }
  0xae   : > { %v503_v42 = vpop.f32.mrf.mxu2 }
  0xaf   : > { %v509_v44 = vadd.f32 %v503_v42, %v473_v41 }
  0xb1   : > { %v517_v45 = vadd.f32 %v720_v25, %v509_v44 }
  0xb3   : > { %v521_v47 = vmax.f32 %v517_v45, 0.0 }
  0xb5   : > { %v523_v48 = vpack.c.bf16 %v521_v47, %v520_v46 }
  0xb7   : > { %703 = vmatmul.msk.bf16.gmra.mxu3 %vm544_vm4, %v523_v48 }
 0x12a   : > { %v560_v50 = vpop.f32.mrf.mxu3 }
 0x12b   : > { %v561_v51 = vadd.f32 %v721_v49, %v560_v50 }
 0x12d   : > { %v570_v52 = vpack.c.bf16 %v561_v51, %v561_v51 }
 0x12f   : > { %575 = vst.msk [vmem:[%s378_s20] sm:$0xf] %vm574_vm5, %v570_v52 }
 0x132   : > { %v562_v53 = vpop.f32.mrf.mxu3 }
 0x133   : > { %v563_v54 = vadd.f32 %v721_v49, %v562_v53 }
 0x135   : > { %v571_v55 = vpack.c.bf16 %v563_v54, %v563_v54 }
 0x137   : > { %576 = vst.msk [vmem:[%s378_s20 + $0x4] sm:$0xf] %vm574_vm5, %v571_v55 }
 0x13a   : > { %v565_v56 = vpop.f32.mrf.mxu3 }
 0x13b   : > { %v566_v57 = vadd.f32 %v721_v49, %v565_v56 }
 0x13d   : > { %v572_v58 = vpack.c.bf16 %v566_v57, %v566_v57 }
 0x13f   : > { %577 = vst.msk [vmem:[%s378_s20 + $0x8] sm:$0xf] %vm574_vm5, %v572_v58 }
 0x142   : > { %v567_v59 = vpop.f32.mrf.mxu3 }
 0x143   : > { %v568_v60 = vadd.f32 %v721_v49, %v567_v59 }
 0x145   : > { %v573_v61 = vpack.c.bf16 %v568_v60, %v568_v60 }
 0x147   : > { %578 = vst.msk [vmem:[%s378_s20 + $0xc] sm:$0xf] %vm574_vm5, %v573_v61 }
 0x148 PF: > { %s19_s30 = sadd.s32 1, %s728_s30  }
 0x149   : > { %p16_p4 = scmp.ge.s32.totalorder %s19_s30, 4  }
 0x14b   :  { %18 = sbr.rel (!%p16_p4) target bundleno = 1 (0x1), region = 92 }

// kernel: _lambda_.3
= control target key start
LH: loop header
LB: loop body
LE: loop exit
PB: predicated region body
PF: predicated region fallthrough
CT: control target
= control target key end

     0   :  { %s844_s17 = smov 0   ;;  %s904_s0 = inlined_call_operand.vmem [shape: f32[16,16], index: 0, kind: input, shape index: {}]   ;;  %s905_s1 = inlined_call_operand.vmem [shape: f32[16,16], index: 1, kind: input, shape index: {}]   ;;  %s906_s2 = inlined_call_operand.vmem [shape: f32[16,8], index: 2, kind: input, shape index: {}]   ;;  %s907_s3 = inlined_call_operand.vmem [shape: f32[16,1], index: 3, kind: input, shape index: {}]   ;;  %s908_s4 = inlined_call_operand.vmem [shape: f32[16,1], index: 4, kind: input, shape index: {}]   ;;  %s909_s5 = inlined_call_operand.vmem [shape: bf16[16,32], index: 5, kind: input, shape index: {}]   ;;  %s910_s6 = inlined_call_operand.vmem [shape: bf16[16,32], index: 6, kind: input, shape index: {}]   ;;  %s911_s7 = inlined_call_operand.vmem [shape: bf16[8,32], index: 7, kind: input, shape index: {}]   ;;  %s912_s8 = inlined_call_operand.vmem [shape: f32[1,32], index: 8, kind: input, shape index: {}]   ;;  %s913_s9 = inlined_call_operand.vmem [shape: bf16[32,8], index: 9, kind: input, shape index: {}]   ;;  %s914_s10 = inlined_call_operand.vmem [shape: f32[1,8], index: 10, kind: input, shape index: {}]   ;;  %s915_s11 = inlined_call_operand.vmem [shape: f32[16,8], index: 11, kind: output, shape index: {}]  }
   0x1 LB: > { %s722_s18 = sadd.s32 4294967295, %s781_s17   ;;  %p726_p0 = scmp.ge.s32.totalorder %s781_s17, 1  ;;  %s781_s17 = sphi %s844_s17, %s21_s17  }
   0x2   : > { %p372_p1 = scmp.lt.s32.totalorder %s781_s17, 3 }
   0x4   : > { %p373_p2 = pnand %p726_p0, %p372_p1 }
   0x5   : > { %p426_p3 = scmp.lt.s32.totalorder (!%p373_p2), %s722_s18, 1 }
   0x6   : > { %376 = sbr.rel (%p373_p2) target bundleno = 437 (0x1b5), region = 64 }
   0xb   : > { %v783_v0 = vmov 0   ;;  %s917_s18 = smov (!%p426_p3, %s722_s18), 1  ;;  %v552_v1 = vld [vmem:[%s911_s7] sm:$0xf]  ;;  %vm557_vm0 = vcmask 1043456   ;;  %vm553_vm9 = vcmask 64512  }
   0xc   : > { %768 = vset.pattern.permute.xlu0 %v783_v0  ;;  %v559_v2 = vsel %vm557_vm0, %v552_v1, 0  ;;  %s855_s21 = sshll.u32 %s917_s18, 3  ;;  %v755_v29 = vld [vmem:[%s909_s5] sm:$0xff]  ;;  %vm513_vm10 = vcmask 130048   ;;  %v758_v41 = vld [vmem:[%s913_s9 + $0x8] sm:$0xff]  ;;  %vm602_vm11 = vcmask 261120  }
   0xd   : > { %568 = vmatpush.bf16.msra.mxu2 %v559_v2  ;;  %s441_s24 = scalar_lea.vmem %s907_s3, %s855_s21  ;;  %s445_s27 = scalar_lea.vmem %s908_s4, %s855_s21  ;;  %546 = vmatpush.bf16.msra.mxu1 %v755_v29  ;;  %v756_v30 = vld [vmem:[%s910_s6] sm:$0xff] }
   0xe   : > { %v451_v3 = vld [vmem:[%s441_s24] sm:$0xff]  ;;  %s437_s30 = scalar_lea.vmem %s906_s2, %s855_s21  ;;  %524 = vmatpush.bf16.msra.mxu0 %v756_v30  ;;  %s429_s19 = scalar_lea.vmem %s904_s0, %s855_s21  ;;  %612 = vmatpush.bf16.msra.mxu3 %v758_v41 }
   0xf   : > { %v468_v4 = vld [vmem:[%s445_s27] sm:$0xff]  ;;  %v452_v5 = vmax.f32 %v451_v3, 1.0  ;;  %s433_s23 = scalar_lea.vmem %s905_s1, %s855_s21  ;;  %s449_s15 = scalar_lea.vmem %s915_s11, %s855_s21 }
  0x10   : > { %v469_v6 = vmax.f32 %v468_v4, 1.0  ;;  %v501_v27 = vld [vmem:[%s437_s30] sm:$0xff] }
  0x11   : > { %771 = vrcp.f32 %v452_v5  ;;  %v464_v10 = vand.u32 2147483648, %v452_v5  ;;  %vm458_vm1 = vweird.f32 %v452_v5  ;;  %v462_v13 = vand.u32 2147483647, %v452_v5  ;;  %v485_v31 = vld [vmem:[%s429_s19] sm:$0xff] }
  0x12   : > { %773 = vrcp.f32 %v469_v6  ;;  %vm475_vm5 = vweird.f32 %v469_v6  ;;  %v481_v19 = vand.u32 2147483648, %v469_v6  ;;  %v479_v22 = vand.u32 2147483647, %v469_v6  ;;  %v493_v35 = vld [vmem:[%s433_s23] sm:$0xff] }
  0x13   : > { %v465_v16 = vor.u32 1.1754944e-38, %v464_v10  ;;  %vm463_vm4 = vcmp.eq.f32.partialorder %v462_v13, 8.507059e+37  ;;  %v502_v28 = vpack.c.bf16 %v501_v27, %v501_v27  ;;  %v757_v42 = vld [vmem:[%s913_s9] sm:$0xff] }
  0x14   : > { %v482_v24 = vor.u32 1.1754944e-38, %v481_v19  ;;  %vm480_vm8 = vcmp.eq.f32.partialorder %v479_v22, 8.507059e+37  ;;  %613 = vmatpush.bf16.msra.mxu3 %v757_v42  ;;  %v769_v47 = vld [vmem:[%s912_s8] ss:$0 sm:$0xff] }
  0x15   : > { %743 = vmatmul.msk.bf16.vlgmr.msra.gmra.mxu2 %vm553_vm9, %v502_v28  ;;  %v770_v53 = vld [vmem:[%s914_s10] ss:$0 sm:$0xff] }
  0x17   : > { %v772_v7 = vpop.eup %771 }
  0x18   : > { %v774_v8 = vpop.eup %773  ;;  %v454_v9 = vmul.f32 %v772_v7, %v452_v5  ;;  %vm459_vm2 = vweird.f32 %v772_v7 }
  0x19   : > { %v471_v11 = vmul.f32 %v774_v8, %v469_v6  ;;  %vm460_vm3 = vmor %vm458_vm1, %vm459_vm2  ;;  %vm476_vm6 = vweird.f32 %v774_v8 }
  0x1a   : > { %v455_v12 = vsub.f32 1.0, %v454_v9  ;;  %vm477_vm7 = vmor %vm475_vm5, %vm476_vm6 }
  0x1b   : > { %v472_v14 = vsub.f32 1.0, %v471_v11 }
  0x1c   : > { %v456_v15 = vmul.f32 %v772_v7, %v455_v12 }
  0x1d   : > { %v473_v17 = vmul.f32 %v774_v8, %v472_v14 }
  0x1e   : > { %v457_v18 = vadd.f32 %v772_v7, %v456_v15 }
  0x1f   : > { %v474_v21 = vadd.f32 %v774_v8, %v473_v17 }
  0x20   : > { %v461_v20 = vsel %vm460_vm3, %v772_v7, %v457_v18 }
  0x21   : > { %v466_v23 = vsel %vm463_vm4, %v465_v16, %v461_v20  ;;  %v478_v25 = vsel %vm477_vm7, %v774_v8, %v474_v21 }
  0x22   : > { %488 = vperm.xlu0 %768, %v466_v23   ;;  %v483_v26 = vsel %vm480_vm8, %v482_v24, %v478_v25 }
  0x2a   : > { %496 = vperm.xlu0 %768, %v483_v26  }
  0x94   : > { %v489_v32 = vpop.permute.xlu0 %488 }
  0x95   : > { %v491_v33 = vmul.f32 %v489_v32, %v485_v31 }
  0x97   : > { %v492_v34 = vpack.c.bf16 %v491_v33, %v491_v33 }
  0x98   : > { %v570_v39 = vpop.f32.mrf.mxu2 }
  0x99   : > { %742 = vmatmul.msk.bf16.vlgmr.msra.gmra.mxu1 %vm513_vm10, %v492_v34 }
  0x9c   : > { %v497_v36 = vpop.permute.xlu0 %496 }
  0x9d   : > { %v499_v37 = vmul.f32 %v497_v36, %v493_v35 }
  0x9f   : > { %v500_v38 = vpack.c.bf16 %v499_v37, %v499_v37 }
  0xa0   : > { %v572_v40 = vpop.f32.mrf.mxu2 }
  0xa1   : > { %737 = vmatmul.msk.bf16.vlgmr.msra.gmra.mxu0 %vm513_vm10, %v500_v38 }
 0x116   : > { %v548_v43 = vpop.f32.mrf.mxu1 }
 0x11e   : > { %v526_v44 = vpop.f32.mrf.mxu0  ;;  %v550_v45 = vpop.f32.mrf.mxu1 }
 0x11f   : > { %v549_v46 = vadd.f32 %v548_v43, %v526_v44 }
 0x121   : > { %v574_v48 = vadd.f32 %v570_v39, %v549_v46 }
 0x123   : > { %v579_v49 = vadd.f32 %v769_v47, %v574_v48 }
 0x125   : > { %v580_v50 = vmax.f32 %v579_v49, 0.0 }
 0x126   : > { %v528_v51 = vpop.f32.mrf.mxu0 }
 0x127   : > { %v581_v52 = vpack.c.bf16 %v580_v50, %v580_v50 }
 0x129   : > { %752 = vmatmul.msk.bf16.vlgmr.msra.gmra.mxu3 %vm602_vm11, %v581_v52 }
 0x1ac   : > { %v615_v54 = vpop.f32.mrf.mxu3 }
 0x1ad   : > { %v616_v55 = vadd.f32 %v770_v53, %v615_v54 }
 0x1af   : > { %v619_v56 = vmul.f32 0.5, %v616_v55 }
 0x1b1   : > { %620 = vst.msk [vmem:[%s449_s15] sm:$0xff] %vm553_vm9, %v619_v56 }
 0x1b4   : > { %v617_v57 = vpop.f32.mrf.mxu3 }
 0x1b5 PF: > { %s21_s17 = sadd.s32 1, %s781_s17  }
 0x1b6   : > { %p18_p4 = scmp.ge.s32.totalorder %s21_s17, 4  }
 0x1b8   :  { %20 = sbr.rel (!%p18_p4) target bundleno = 1 (0x1), region = 106 }

</bundles_post_ra>
